<compile_context>
chip_gen: v7x
topology: tpu7x:2x2x1
jax: 0.10.0
libtpu: 0.0.40
codegen_flags: <defaults>
</compile_context>

<pallas_src>
import jax
import jax.numpy as jnp
from jax.experimental import pallas as pl
from jax.experimental.pallas import tpu as pltpu


def transition_kernel(x_ref, scale_ref, bias_ref, w_ref, o_ref):
    # x_ref:     (1, 4, tile_hw, Cin)  4 pooling phases, channels-last
    # scale_ref: (1, Cin)              folded BN scale = gamma / sqrt(var + eps)
    # bias_ref:  (1, Cin)              folded BN bias  = beta - mean * scale
    # w_ref:     (Cin, Cout_pad)       1x1 conv weight, bf16, lane-padded Cout
    # o_ref:     (1, tile_hw, Cout_pad)
    s = scale_ref[...]                                   # (1, Cin)
    b = bias_ref[...]                                    # (1, Cin)
    # BN + ReLU on each phase, then average the 2x2 window (all VPU work).
    pooled = (jnp.maximum(x_ref[0, 0] * s + b, 0.0)
              + jnp.maximum(x_ref[0, 1] * s + b, 0.0)
              + jnp.maximum(x_ref[0, 2] * s + b, 0.0)
              + jnp.maximum(x_ref[0, 3] * s + b, 0.0)) * 0.25   # (tile_hw, Cin) f32
    # 1x1 conv = single matmul; bf16 operands, f32 accumulation on the MXU.
    y = jnp.dot(pooled.astype(jnp.bfloat16), w_ref[...],
                preferred_element_type=jnp.float32)             # (tile_hw, Cout_pad)
    o_ref[0] = y.astype(o_ref.dtype)


def _pick_tile(total, max_rows=512):
    """Largest multiple-of-8 divisor of `total` that is <= max_rows, else `total`."""
    if total <= max_rows:
        return total
    start = max_rows - (max_rows % 8)
    for d in range(start, 7, -8):
        if total % d == 0:
            return d
    return total  # fallback: single (full) block


def transition_forward(x_nchw, gamma, beta, running_mean, running_var, conv_w,
                       eps=1e-5):
    """Pallas implementation of Transition.forward (eval-mode BN). x_nchw: (N, Cin, H, W)."""
    N, Cin, H, W = x_nchw.shape
    Cout = conv_w.shape[0]
    assert H % 2 == 0 and W % 2 == 0, "2x2 avg-pool expects even spatial dims"
    Hp, Wp = H // 2, W // 2
    HWp = Hp * Wp

    # Fold BN (inference mode) into per-channel scale/bias.
    scale = gamma / jnp.sqrt(running_var + eps)               # (Cin,)
    bias = beta - running_mean * scale                        # (Cin,)

    # 1x1 conv weight -> (Cin, Cout), bf16, lane-pad Cout to a multiple of 128.
    Cout_pad = ((Cout + 127) // 128) * 128
    w = conv_w.reshape(Cout, Cin).T.astype(jnp.bfloat16)      # (Cin, Cout)
    if Cout_pad != Cout:
        w = jnp.pad(w, ((0, 0), (0, Cout_pad - Cout)))

    # NCHW -> 4-phase channels-last layout (one fused XLA transpose):
    #   (N, Cin, Hp, 2, Wp, 2) -> (N, 2, 2, Hp, Wp, Cin) -> (N, 4, Hp*Wp, Cin)
    x_ph = x_nchw.reshape(N, Cin, Hp, 2, Wp, 2)
    x_ph = jnp.transpose(x_ph, (0, 3, 5, 2, 4, 1)).reshape(N, 4, HWp, Cin)

    tile_hw = _pick_tile(HWp, 512)
    n_tiles = HWp // tile_hw

    out = pl.pallas_call(
        transition_kernel,
        out_shape=jax.ShapeDtypeStruct((N, HWp, Cout_pad), jnp.float32),
        grid=(N, n_tiles),
        in_specs=[
            pl.BlockSpec((1, 4, tile_hw, Cin), lambda n, t: (n, 0, t, 0)),
            pl.BlockSpec((1, Cin), lambda n, t: (0, 0)),
            pl.BlockSpec((1, Cin), lambda n, t: (0, 0)),
            pl.BlockSpec((Cin, Cout_pad), lambda n, t: (0, 0)),
        ],
        out_specs=pl.BlockSpec((1, tile_hw, Cout_pad), lambda n, t: (n, t, 0)),
        compiler_params=pltpu.CompilerParams(
            dimension_semantics=("parallel", "parallel")),
    )(x_ph, scale.reshape(1, Cin), bias.reshape(1, Cin), w)

    # Drop lane padding, back to NCHW.
    out = out[:, :, :Cout].reshape(N, Hp, Wp, Cout)
    return jnp.transpose(out, (0, 3, 1, 2))                   # (N, Cout, Hp, Wp)


def _reference(x_nchw, gamma, beta, running_mean, running_var, conv_w, eps=1e-5):
    """Pure-JAX reference matching PyTorch eval-mode Transition.forward."""
    inv = 1.0 / jnp.sqrt(running_var + eps)
    bn = (x_nchw - running_mean[None, :, None, None]) * (gamma * inv)[None, :, None, None] \
         + beta[None, :, None, None]
    h = jnp.maximum(bn, 0.0)                                  # (N, Cin, H, W)
    y = jnp.einsum("nchw,oc->nohw", h, conv_w.reshape(conv_w.shape[0], -1))
    N, Co, H, W = y.shape
    y = y.reshape(N, Co, H // 2, 2, W // 2, 2).mean(axis=(3, 5))
    return y


if __name__ == "__main__":
    key = jax.random.PRNGKey(0)
    k_x, k_g, k_b, k_m, k_v, k_w = jax.random.split(key, 6)

    N, Cin, H, W = 2, 4, 16, 16
    Cout = Cin // 2  # typical DenseNet transition halves the channels

    x = jax.random.normal(k_x, (N, Cin, H, W), dtype=jnp.float32)
    gamma = jax.random.normal(k_g, (Cin,), dtype=jnp.float32) * 0.1 + 1.0
    beta = jax.random.normal(k_b, (Cin,), dtype=jnp.float32) * 0.1
    running_mean = jax.random.normal(k_m, (Cin,), dtype=jnp.float32) * 0.1
    running_var = jnp.abs(jax.random.normal(k_v, (Cin,), dtype=jnp.float32)) + 0.5
    conv_w = jax.random.normal(k_w, (Cout, Cin, 1, 1), dtype=jnp.float32) * 0.1

    out = transition_forward(x, gamma, beta, running_mean, running_var, conv_w)
    out = jax.block_until_ready(out)

    ref = _reference(x, gamma, beta, running_mean, running_var, conv_w)
    assert out.shape == (N, Cout, H // 2, W // 2), out.shape
    # bf16 MXU operands (f32 accumulation) -> relaxed tolerance vs the f32 reference.
    assert jnp.allclose(out, ref, rtol=2e-2, atol=2e-2), float(jnp.max(jnp.abs(out - ref)))

    print("KERNEL_OK")
</pallas_src>

<mosaic_0001>
module attributes {stable_mosaic.version = 11 : i64} {
  func.func @transition_kernel(%arg0: i32, %arg1: i32, %arg2: memref<1x4x64x4xf32, #tpu.memory_space<vmem>>, %arg3: memref<1x4xf32, #tpu.memory_space<vmem>>, %arg4: memref<1x4xf32, #tpu.memory_space<vmem>>, %arg5: memref<4x128xbf16, #tpu.memory_space<vmem>>, %arg6: memref<1x64x128xf32, #tpu.memory_space<vmem>>) attributes {dimension_semantics = [#tpu.dimension_semantics<parallel>, #tpu.dimension_semantics<parallel>], iteration_bounds = array<i64: 2, 1>, scalar_prefetch = 0 : i64, scratch_operands = 0 : i64, tpu.core_type = #tpu.core_type<tc>, window_params = [{transform_indices = @transform_0, window_bounds = array<i64: 1, 4, 64, 4>}, {pipeline_mode = #tpu.pipeline_mode<synchronous>, transform_indices = @transform_1, window_bounds = array<i64: 1, 4>}, {pipeline_mode = #tpu.pipeline_mode<synchronous>, transform_indices = @transform_2, window_bounds = array<i64: 1, 4>}, {pipeline_mode = #tpu.pipeline_mode<synchronous>, transform_indices = @transform_3, window_bounds = array<i64: 4, 128>}, {transform_indices = @transform_4, window_bounds = array<i64: 1, 64, 128>}]} {
    %c0 = arith.constant 0 : index
    %c0_0 = arith.constant 0 : index
    %0 = vector.load %arg3[%c0, %c0_0] : memref<1x4xf32, #tpu.memory_space<vmem>>, vector<1x4xf32>
    %c0_1 = arith.constant 0 : index
    %c0_2 = arith.constant 0 : index
    %1 = vector.load %arg4[%c0_1, %c0_2] : memref<1x4xf32, #tpu.memory_space<vmem>>, vector<1x4xf32>
    %c0_3 = arith.constant 0 : index
    %c0_4 = arith.constant 0 : index
    %c0_5 = arith.constant 0 : index
    %c0_6 = arith.constant 0 : index
    %2 = vector.load %arg2[%c0_3, %c0_4, %c0_5, %c0_6] : memref<1x4x64x4xf32, #tpu.memory_space<vmem>>, vector<1x1x64x4xf32>
    %3 = vector.shape_cast %2 : vector<1x1x64x4xf32> to vector<64x4xf32>
    %4 = vector.broadcast %0 : vector<1x4xf32> to vector<64x4xf32>
    %5 = arith.mulf %3, %4 : vector<64x4xf32>
    %6 = vector.broadcast %1 : vector<1x4xf32> to vector<64x4xf32>
    %7 = arith.addf %5, %6 : vector<64x4xf32>
    %cst = arith.constant 0.000000e+00 : f32
    %8 = vector.broadcast %cst : f32 to vector<64x4xf32>
    %9 = arith.maximumf %7, %8 : vector<64x4xf32>
    %c0_7 = arith.constant 0 : index
    %c1 = arith.constant 1 : index
    %c0_8 = arith.constant 0 : index
    %c0_9 = arith.constant 0 : index
    %10 = vector.load %arg2[%c0_7, %c1, %c0_8, %c0_9] : memref<1x4x64x4xf32, #tpu.memory_space<vmem>>, vector<1x1x64x4xf32>
    %11 = vector.shape_cast %10 : vector<1x1x64x4xf32> to vector<64x4xf32>
    %12 = vector.broadcast %0 : vector<1x4xf32> to vector<64x4xf32>
    %13 = arith.mulf %11, %12 : vector<64x4xf32>
    %14 = vector.broadcast %1 : vector<1x4xf32> to vector<64x4xf32>
    %15 = arith.addf %13, %14 : vector<64x4xf32>
    %cst_10 = arith.constant 0.000000e+00 : f32
    %16 = vector.broadcast %cst_10 : f32 to vector<64x4xf32>
    %17 = arith.maximumf %15, %16 : vector<64x4xf32>
    %18 = arith.addf %9, %17 : vector<64x4xf32>
    %c0_11 = arith.constant 0 : index
    %c2 = arith.constant 2 : index
    %c0_12 = arith.constant 0 : index
    %c0_13 = arith.constant 0 : index
    %19 = vector.load %arg2[%c0_11, %c2, %c0_12, %c0_13] : memref<1x4x64x4xf32, #tpu.memory_space<vmem>>, vector<1x1x64x4xf32>
    %20 = vector.shape_cast %19 : vector<1x1x64x4xf32> to vector<64x4xf32>
    %21 = vector.broadcast %0 : vector<1x4xf32> to vector<64x4xf32>
    %22 = arith.mulf %20, %21 : vector<64x4xf32>
    %23 = vector.broadcast %1 : vector<1x4xf32> to vector<64x4xf32>
    %24 = arith.addf %22, %23 : vector<64x4xf32>
    %cst_14 = arith.constant 0.000000e+00 : f32
    %25 = vector.broadcast %cst_14 : f32 to vector<64x4xf32>
    %26 = arith.maximumf %24, %25 : vector<64x4xf32>
    %27 = arith.addf %18, %26 : vector<64x4xf32>
    %c0_15 = arith.constant 0 : index
    %c3 = arith.constant 3 : index
    %c0_16 = arith.constant 0 : index
    %c0_17 = arith.constant 0 : index
    %28 = vector.load %arg2[%c0_15, %c3, %c0_16, %c0_17] : memref<1x4x64x4xf32, #tpu.memory_space<vmem>>, vector<1x1x64x4xf32>
    %29 = vector.shape_cast %28 : vector<1x1x64x4xf32> to vector<64x4xf32>
    %30 = vector.broadcast %0 : vector<1x4xf32> to vector<64x4xf32>
    %31 = arith.mulf %29, %30 : vector<64x4xf32>
    %32 = vector.broadcast %1 : vector<1x4xf32> to vector<64x4xf32>
    %33 = arith.addf %31, %32 : vector<64x4xf32>
    %cst_18 = arith.constant 0.000000e+00 : f32
    %34 = vector.broadcast %cst_18 : f32 to vector<64x4xf32>
    %35 = arith.maximumf %33, %34 : vector<64x4xf32>
    %36 = arith.addf %27, %35 : vector<64x4xf32>
    %cst_19 = arith.constant 2.500000e-01 : f32
    %37 = vector.broadcast %cst_19 : f32 to vector<64x4xf32>
    %38 = arith.mulf %36, %37 : vector<64x4xf32>
    %39 = arith.truncf %38 : vector<64x4xf32> to vector<64x4xbf16>
    %c0_20 = arith.constant 0 : index
    %c0_21 = arith.constant 0 : index
    %40 = vector.load %arg5[%c0_20, %c0_21] : memref<4x128xbf16, #tpu.memory_space<vmem>>, vector<4x128xbf16>
    %cst_22 = arith.constant dense<0.000000e+00> : vector<64x128xf32>
    %41 = tpu.matmul %39, %40, %cst_22 {dimension_numbers = #tpu.dot_dimension_numbers<[1], [0], [0], [1], [0, 0, 1, 1], [], []>} : vector<64x4xbf16>, vector<4x128xbf16>, vector<64x128xf32> -> vector<64x128xf32>
    %c0_23 = arith.constant 0 : index
    %c0_24 = arith.constant 0 : index
    %c0_25 = arith.constant 0 : index
    %42 = vector.load %arg6[%c0_23, %c0_24, %c0_25] : memref<1x64x128xf32, #tpu.memory_space<vmem>>, vector<1x64x128xf32>
    %43 = vector.shape_cast %42 : vector<1x64x128xf32> to vector<64x128xf32>
    %44 = vector.shape_cast %41 : vector<64x128xf32> to vector<1x64x128xf32>
    tpu.vector_store %arg6[%c0_23, %c0_24, %c0_25], %44 {strides = array<i32>} : memref<1x64x128xf32, #tpu.memory_space<vmem>>, vector<1x64x128xf32>,
    return
  }
  func.func @transform_0(%arg0: i32, %arg1: i32) -> (i32, i32, i32, i32) {
    %c0_i32 = arith.constant 0 : i32
    %c0_i32_0 = arith.constant 0 : i32
    %c0_i32_1 = arith.constant 0 : i32
    return %arg0, %c0_i32, %arg1, %c0_i32_0 : i32, i32, i32, i32
  }
  func.func @transform_1(%arg0: i32, %arg1: i32) -> (i32, i32) {
    %c0_i32 = arith.constant 0 : i32
    %c0_i32_0 = arith.constant 0 : i32
    %c0_i32_1 = arith.constant 0 : i32
    return %c0_i32, %c0_i32_0 : i32, i32
  }
  func.func @transform_2(%arg0: i32, %arg1: i32) -> (i32, i32) {
    %c0_i32 = arith.constant 0 : i32
    %c0_i32_0 = arith.constant 0 : i32
    %c0_i32_1 = arith.constant 0 : i32
    return %c0_i32, %c0_i32_0 : i32, i32
  }
  func.func @transform_3(%arg0: i32, %arg1: i32) -> (i32, i32) {
    %c0_i32 = arith.constant 0 : i32
    %c0_i32_0 = arith.constant 0 : i32
    %c0_i32_1 = arith.constant 0 : i32
    return %c0_i32, %c0_i32_0 : i32, i32
  }
  func.func @transform_4(%arg0: i32, %arg1: i32) -> (i32, i32, i32) {
    %c0_i32 = arith.constant 0 : i32
    %c0_i32_0 = arith.constant 0 : i32
    return %arg0, %arg1, %c0_i32 : i32, i32, i32
  }
}

</mosaic_0001>

<bundles_post_ra>
// kernel: tpu_custom_call.1
= control target key start
LH: loop header
LB: loop body
LE: loop exit
PB: predicated region body
PF: predicated region fallthrough
CT: control target
= control target key end

     0   :  { %9 = vsyncpa [#allocation3], 0  ;;  %s1054_s0 = inlined_call_operand.vmem [shape: f32[2,4,64,4], index: 0, kind: input, shape index: {}]   ;;  %s1055_s1 = inlined_call_operand.vmem [shape: f32[1,4], index: 1, kind: input, shape index: {}]   ;;  %s1056_s2 = inlined_call_operand.vmem [shape: f32[1,4], index: 2, kind: input, shape index: {}]   ;;  %s1057_s3 = inlined_call_operand.vmem [shape: bf16[4,128], index: 3, kind: input, shape index: {}]   ;;  %s1058_s4 = inlined_call_operand.hbm [shape: f32[2,64,128], index: 4, kind: output, shape index: {}]  }
   0x1   :  { %11 = vsyncpa [#allocation3 + $0x1], 0  ;;  %s824_s15 = smov 0   ;;  %s826_s16 = smov 0  }
   0x2   :  { %s828_s17 = smov 0   ;;  %s830_s18 = smov 0  }
   0x3   :  { %s832_s19 = smov 0   ;;  %s834_s20 = smov 0  }
   0x4 LB: > { %s595_s21 = sadd.s32 4294967295, %s794_s20   ;;  %s596_s22 = sadd.s32 4294967294, %s794_s20   ;;  %s794_s20 = sphi %s834_s20, %s17_s20   ;;  %s790_s19 = sphi %s832_s19, %s1065_s19   ;;  %s786_s18 = sphi %s830_s18, %s1064_s18   ;;  %s782_s17 = sphi %s828_s17, %s1063_s17   ;;  %s778_s16 = sphi %s826_s16, %s1062_s16   ;;  %s774_s15 = sphi %s824_s15, %s1061_s15  }
   0x5   : > { %s29_s23 = sadd.s32 1, %s790_s19  ;;  %s129_s24 = sadd.s32 1, %s782_s17 }
   0x6   : > { %p31_p0 = scmp.ge.s32.totalorder %s29_s23, 2  ;;  %p139_p1 = scmp.ne.s32.totalorder %s782_s17, %s778_s16 }
   0x7   : > { %p140_p2 = scmp.eq.s32.totalorder %s595_s21, 1  ;;  %p145_p3 = scmp.ne.s32.totalorder %s778_s16, %s774_s15 }
   0x8   : > { %s1067_s23 = smov (%p31_p0, %s29_s23), 0  ;;  %p146_p5 = scmp.eq.s32.totalorder %s596_s22, 1 }
   0x9   : > { %p864_p4 = por %p140_p2, %p139_p1  ;;  %s124_s26 = ssub.s32 %s790_s19, %s1067_s23 }
   0xa   : > { %p599_p6 = scmp.ge.s32.totalorder %s794_s20, 1  ;;  %p127_p7 = scmp.eq.s32.totalorder %s124_s26, 0 }
   0xb   : > { %p871_p8 = por %p146_p5, %p145_p3  ;;  %p186_p9 = scmp.lt.s32.totalorder %s794_s20, 3 }
   0xc   : > { %s877_s28 = scalar_select %p127_p7, %s782_s17, %s129_s24  }
   0xd   : > { %p187_p10 = pnand %p599_p6, %p186_p9 }
   0xe   : > { %v409_v0 = vld [vmem:[%s1057_s3] sm:$0x3] (!%p187_p10)  ;;  %vm423_vm0 = vcmask (!%p187_p10), 1041408   ;;  %p217_p11 = scmp.lt.s32.totalorder (!%p187_p10), %s786_s18, 1  ;;  %vm410_vm1 = vcmask (!%p187_p10), 31744   ;;  %s213_s14 = sand.u32 (!%p187_p10), 1, %s778_s16  }
   0xf   : > { %190 = sbr.rel (%p187_p10) target bundleno = 298 (0x12a), region = 36  ;;  %657 = vmatprep.subr.msk.bf16.mxu0 (!%p187_p10), %vm423_vm0, %v409_v0  ;;  %658 = vmatprep.subr.msk.bf16.mxu1 (!%p187_p10), %vm423_vm0, %v409_v0  ;;  %v425_v1 = vsel (!%p187_p10), %vm423_vm0, %v409_v0, 0  ;;  %v887_v2 = vld [vmem:[%s1055_s1] ss:$0 sm:$0xff] (!%p187_p10)  ;;  %s600_s21 = sshll.u32 (!%p187_p10), %s213_s14, 6 }
  0x10   : > { %646 = vmatpush3.bf16.msra.mxu0 (!%p187_p10), %v425_v1  ;;  %656 = vmatpush3.bf16.msra.mxu1 (!%p187_p10), %v425_v1  ;;  %v897_v3 = vld [vmem:[%s1056_s2] ss:$0 sm:$0xff] (!%p187_p10)  ;;  %s215_s22 = scalar_lea.vmem (!%p187_p10), [#allocation2], %s600_s21  ;;  %s639_s26 = sshll.u32 (!%p187_p10), %s786_s18, 10 }
  0x11   : > { %s516_s24 = sshll.u32 (!%p187_p10), %s215_s22, 4  ;;  %s796_s7 = smov (!%p187_p10), [#allocation2]   ;;  %s1001_s24 = int_to_ptr.vmem [resolvable:$true] %s516_s24 }
  0x12   : > { %s720_s8 = sshll.u32 (!%p187_p10), %s796_s7, 4  ;;  %s721_s8 = int_to_ptr.vmem [resolvable:$false] %s720_s8 }
  0x13   : > { %s722_s9 = scalar_lea.vmem (!%p187_p10), %s721_s8, 2048  ;;  %p723_p1 = scmp.lt.s32.totalorder (!%p187_p10), %s1001_s24, %s721_s8 }
  0x16   : > { %s218_s5 = scalar_select %p217_p11, %s786_s18, 1 }
  0x17   : > { %s716_s18 = scalar_lea.vmem %s1001_s24, 1024 }
  0x18   : > { %s638_s6 = sshll.u32 %s218_s5, 8  ;;  %s1006_s5 = scalar_lea.hbm %s1058_s4, %s639_s26 }
  0x19   : > { %s892_s11 = scalar_lea.vmem %s1054_s0, %s638_s6  ;;  %s1008_s6 = scalar_lea.sflag [#allocation3], %s213_s14 }
  0x1a   : > { %v230_v4 = vld [vmem:[%s892_s11] sm:$0xff]  ;;  %v231_v5 = vld [vmem:[%s892_s11 + $0x8] sm:$0xff]  ;;  %p717_p12 = scmp.ne.s32.totalorder %s1001_s24, %s716_s18  ;;  %p724_p2 = scmp.lt.s32.totalorder %s722_s9, %s716_s18 }
  0x1b   : > { %v605_v6 = vld [vmem:[%s892_s11 + $0x40] sm:$0xff]  ;;  %v244_v7 = vmul.f32 %v887_v2, %v230_v4  ;;  %v245_v8 = vmul.f32 %v887_v2, %v231_v5  ;;  %v606_v9 = vld [vmem:[%s892_s11 + $0x48] sm:$0xff]  ;;  %v232_v4 = vld [vmem:[%s892_s11 + $0x10] sm:$0xff] }
  0x1c   : > { %v283_v10 = vmul.f32 %v605_v6, %v887_v2  ;;  %v613_v11 = vld [vmem:[%s892_s11 + $0x80] sm:$0xff]  ;;  %v614_v12 = vld [vmem:[%s892_s11 + $0x88] sm:$0xff]  ;;  %v284_v13 = vmul.f32 %v606_v9, %v887_v2  ;;  %v233_v5 = vld [vmem:[%s892_s11 + $0x18] sm:$0xff]  ;;  %p718_p13 = pnand %p717_p12, %p864_p4  ;;  %p725_p3 = por %p724_p2, %p723_p1 }
  0x1d   : > { %v324_v14 = vmul.f32 %v613_v11, %v887_v2  ;;  %v325_v15 = vmul.f32 %v614_v12, %v887_v2  ;;  %v621_v16 = vld [vmem:[%s892_s11 + $0xc0] sm:$0xff]  ;;  %v622_v17 = vld [vmem:[%s892_s11 + $0xc8] sm:$0xff]  ;;  %v258_v18 = vadd.f32 %v897_v3, %v244_v7  ;;  %v259_v19 = vadd.f32 %v897_v3, %v245_v8 }
  0x1e   : > { %v291_v20 = vadd.f32 %v897_v3, %v283_v10  ;;  %v365_v21 = vmul.f32 %v621_v16, %v887_v2  ;;  %v292_v22 = vadd.f32 %v897_v3, %v284_v13  ;;  %v366_v25 = vmul.f32 %v622_v17, %v887_v2  ;;  %v234_v26 = vld [vmem:[%s892_s11 + $0x20] sm:$0xff]  ;;  %v235_v27 = vld [vmem:[%s892_s11 + $0x28] sm:$0xff]  ;;  %v607_v10 = vld [vmem:[%s892_s11 + $0x50] sm:$0xff]  ;;  %p719_p0 = pneg %p718_p13 }
  0x1f   : > { %v332_v23 = vadd.f32 %v897_v3, %v324_v14  ;;  %v333_v24 = vadd.f32 %v897_v3, %v325_v15  ;;  %v266_v28 = vmax.f32 %v258_v18, 0.0  ;;  %v267_v29 = vmax.f32 %v259_v19, 0.0  ;;  %v609_v32 = vld [vmem:[%s892_s11 + $0x60] sm:$0xff]  ;;  %v610_v33 = vld [vmem:[%s892_s11 + $0x68] sm:$0xff]  ;;  %v608_v19 = vld [vmem:[%s892_s11 + $0x58] sm:$0xff] }
  0x20   : > { %v299_v30 = vmax.f32 %v291_v20, 0.0  ;;  %v373_v31 = vadd.f32 %v897_v3, %v365_v21  ;;  %v300_v34 = vmax.f32 %v292_v22, 0.0  ;;  %v374_v37 = vadd.f32 %v897_v3, %v366_v25  ;;  %v617_v38 = vld [vmem:[%s892_s11 + $0xa0] sm:$0xff]  ;;  %v618_v43 = vld [vmem:[%s892_s11 + $0xa8] sm:$0xff]  ;;  %v615_v20 = vld [vmem:[%s892_s11 + $0x90] sm:$0xff]  ;;  %p726_p5 = pnand %p725_p3, %p719_p0 }
  0x21   : > { %v340_v35 = vmax.f32 %v332_v23, 0.0  ;;  %v341_v36 = vmax.f32 %v333_v24, 0.0  ;;  %v248_v41 = vmul.f32 %v887_v2, %v234_v26  ;;  %v249_v42 = vmul.f32 %v887_v2, %v235_v27  ;;  %v625_v56 = vld [vmem:[%s892_s11 + $0xe0] sm:$0xff]  ;;  %v626_v57 = vld [vmem:[%s892_s11 + $0xe8] sm:$0xff]  ;;  %v616_v21 = vld [vmem:[%s892_s11 + $0x98] sm:$0xff] }
  0x22   : > { %v307_v39 = vadd.f32 %v299_v30, %v266_v28  ;;  %v381_v40 = vmax.f32 %v373_v31, 0.0  ;;  %v308_v44 = vadd.f32 %v300_v34, %v267_v29  ;;  %v382_v45 = vmax.f32 %v374_v37, 0.0  ;;  %v623_v34 = vld [vmem:[%s892_s11 + $0xd0] sm:$0xff] }
  0x23   : > { %v287_v46 = vmul.f32 %v609_v32, %v887_v2  ;;  %v288_v47 = vmul.f32 %v610_v33, %v887_v2  ;;  %v262_v49 = vadd.f32 %v897_v3, %v248_v41  ;;  %v263_v50 = vadd.f32 %v897_v3, %v249_v42 }
  0x24   : > { %v348_v48 = vadd.f32 %v340_v35, %v307_v39  ;;  %v328_v51 = vmul.f32 %v617_v38, %v887_v2  ;;  %v349_v52 = vadd.f32 %v341_v36, %v308_v44  ;;  %v329_v55 = vmul.f32 %v618_v43, %v887_v2  ;;  %v624_v35 = vld [vmem:[%s892_s11 + $0xd8] sm:$0xff]  ;;  %v236_v44 = vld [vmem:[%s892_s11 + $0x30] sm:$0xff] }
  0x25   : > { %v295_v53 = vadd.f32 %v897_v3, %v287_v46  ;;  %v296_v54 = vadd.f32 %v897_v3, %v288_v47  ;;  %v270_v59 = vmax.f32 %v262_v49, 0.0  ;;  %v271_v60 = vmax.f32 %v263_v50, 0.0  ;;  %v237_v49 = vld [vmem:[%s892_s11 + $0x38] sm:$0xff]  ;;  %v611_v50 = vld [vmem:[%s892_s11 + $0x70] sm:$0xff] }
  0x26   : > { %v389_v58 = vadd.f32 %v381_v40, %v348_v48  ;;  %v336_v61 = vadd.f32 %v897_v3, %v328_v51  ;;  %v390_v62 = vadd.f32 %v382_v45, %v349_v52  ;;  %v337_v1 = vadd.f32 %v897_v3, %v329_v55  ;;  %v612_v55 = vld [vmem:[%s892_s11 + $0x78] sm:$0xff] }
  0x27   : > { %v303_v63 = vmax.f32 %v295_v53, 0.0  ;;  %v304_v0 = vmax.f32 %v296_v54, 0.0  ;;  %v369_v8 = vmul.f32 %v625_v56, %v887_v2  ;;  %v370_v9 = vmul.f32 %v626_v57, %v887_v2 }
  0x28   : > { %v397_v6 = vmul.f32 0.25, %v389_v58  ;;  %v344_v7 = vmax.f32 %v336_v61, 0.0  ;;  %v398_v11 = vmul.f32 0.25, %v390_v62  ;;  %v345_v14 = vmax.f32 %v337_v1, 0.0  ;;  %v620_v1 = vld [vmem:[%s892_s11 + $0xb8] sm:$0xff] }
  0x29   : > { %v311_v12 = vadd.f32 %v303_v63, %v270_v59  ;;  %v312_v13 = vadd.f32 %v304_v0, %v271_v60  ;;  %v377_v15 = vadd.f32 %v897_v3, %v369_v8  ;;  %v378_v16 = vadd.f32 %v897_v3, %v370_v9  ;;  %v619_v60 = vld [vmem:[%s892_s11 + $0xb0] sm:$0xff] }
  0x2a   : > { %v246_v17 = vmul.f32 %v887_v2, %v232_v4  ;;  %v247_v18 = vmul.f32 %v887_v2, %v233_v5  ;;  %v405_v22 = vpack.c.bf16 %v398_v11, %v397_v6  ;;  %v285_v25 = vmul.f32 %v607_v10, %v887_v2 }
  0x2b   : > { %v352_v23 = vadd.f32 %v344_v7, %v311_v12  ;;  %v353_v24 = vadd.f32 %v345_v14, %v312_v13  ;;  %v385_v26 = vmax.f32 %v377_v15, 0.0  ;;  %v386_v27 = vmax.f32 %v378_v16, 0.0  ;;  %v627_v12 = vld [vmem:[%s892_s11 + $0xf0] sm:$0xff] }
  0x2c   : > { %v260_v28 = vadd.f32 %v897_v3, %v246_v17  ;;  %v261_v29 = vadd.f32 %v897_v3, %v247_v18  ;;  %647 = vmatprep.mubr.msk.bf16.mxu0 %vm410_vm1, %v405_v22  ;;  %v286_v30 = vmul.f32 %v608_v19, %v887_v2  ;;  %v293_v31 = vadd.f32 %v897_v3, %v285_v25  ;;  %v628_v17 = vld [vmem:[%s892_s11 + $0xf8] sm:$0xff] }
  0x2d   : > { %v326_v32 = vmul.f32 %v615_v20, %v887_v2  ;;  %v327_v33 = vmul.f32 %v616_v21, %v887_v2  ;;  %v393_v36 = vadd.f32 %v385_v26, %v352_v23  ;;  %v394_v37 = vadd.f32 %v386_v27, %v353_v24 }
  0x2e   : > { %v268_v38 = vmax.f32 %v260_v28, 0.0  ;;  %v269_v39 = vmax.f32 %v261_v29, 0.0  ;;  %v294_v40 = vadd.f32 %v897_v3, %v286_v30  ;;  %v301_v41 = vmax.f32 %v293_v31, 0.0 }
  0x2f   : > { %v334_v42 = vadd.f32 %v897_v3, %v326_v32  ;;  %v335_v43 = vadd.f32 %v897_v3, %v327_v33  ;;  %v401_v45 = vmul.f32 0.25, %v393_v36  ;;  %v402_v46 = vmul.f32 0.25, %v394_v37 }
  0x30   : > { %v367_v47 = vmul.f32 %v623_v34, %v887_v2  ;;  %v368_v48 = vmul.f32 %v624_v35, %v887_v2  ;;  %v302_v51 = vmax.f32 %v294_v40, 0.0  ;;  %v309_v52 = vadd.f32 %v301_v41, %v268_v38 }
  0x31   : > { %v342_v53 = vmax.f32 %v334_v42, 0.0  ;;  %v343_v54 = vmax.f32 %v335_v43, 0.0  ;;  %v407_v56 = vpack.c.bf16 %v402_v46, %v401_v45  ;;  %v250_v59 = vmul.f32 %v887_v2, %v236_v44 }
  0x32   : > { %v375_v57 = vadd.f32 %v897_v3, %v367_v47  ;;  %v376_v58 = vadd.f32 %v897_v3, %v368_v48  ;;  %v310_v61 = vadd.f32 %v302_v51, %v269_v39  ;;  %v251_v63 = vmul.f32 %v887_v2, %v237_v49 }
  0x33   : > { %v350_v62 = vadd.f32 %v342_v53, %v309_v52  ;;  %v289_v0 = vmul.f32 %v611_v50, %v887_v2  ;;  %651 = vmatprep.mubr.msk.bf16.mxu1 %vm410_vm1, %v407_v56  ;;  %v264_v6 = vadd.f32 %v897_v3, %v250_v59  ;;  %v290_v7 = vmul.f32 %v612_v55, %v887_v2 }
  0x34   : > { %v383_v4 = vmax.f32 %v375_v57, 0.0  ;;  %v384_v5 = vmax.f32 %v376_v58, 0.0  ;;  %v351_v8 = vadd.f32 %v343_v54, %v310_v61  ;;  %v265_v9 = vadd.f32 %v897_v3, %v251_v63 }
  0x35   : > { %v297_v10 = vadd.f32 %v897_v3, %v289_v0  ;;  %v330_v11 = vmul.f32 %v619_v60, %v887_v2  ;;  %v272_v14 = vmax.f32 %v264_v6, 0.0  ;;  %v298_v15 = vadd.f32 %v897_v3, %v290_v7 }
  0x36   : > { %v391_v13 = vadd.f32 %v383_v4, %v350_v62  ;;  %v331_v16 = vmul.f32 %v620_v1, %v887_v2  ;;  %v392_v18 = vadd.f32 %v384_v5, %v351_v8  ;;  %v273_v19 = vmax.f32 %v265_v9, 0.0 }
  0x37   : > { %v305_v20 = vmax.f32 %v297_v10, 0.0  ;;  %v338_v21 = vadd.f32 %v897_v3, %v330_v11  ;;  %v306_v23 = vmax.f32 %v298_v15, 0.0  ;;  %v371_v25 = vmul.f32 %v627_v12, %v887_v2 }
  0x38   : > { %v399_v22 = vmul.f32 0.25, %v391_v13  ;;  %v339_v24 = vadd.f32 %v897_v3, %v331_v16  ;;  %v400_v26 = vmul.f32 0.25, %v392_v18  ;;  %v372_v29 = vmul.f32 %v628_v17, %v887_v2 }
  0x39   : > { %v313_v27 = vadd.f32 %v305_v20, %v272_v14  ;;  %v346_v28 = vmax.f32 %v338_v21, 0.0  ;;  %v314_v30 = vadd.f32 %v306_v23, %v273_v19  ;;  %v379_v32 = vadd.f32 %v897_v3, %v371_v25 }
  0x3a   : > { %v347_v31 = vmax.f32 %v339_v24, 0.0  ;;  %v406_v33 = vpack.c.bf16 %v400_v26, %v399_v22  ;;  %v380_v35 = vadd.f32 %v897_v3, %v372_v29 }
  0x3b   : > { %v354_v34 = vadd.f32 %v346_v28, %v313_v27  ;;  %v387_v37 = vmax.f32 %v379_v32, 0.0 }
  0x3c   : > { %v355_v36 = vadd.f32 %v347_v31, %v314_v30  ;;  %648 = vmatmul.mubr.msk.bf16.vlgmr.msra.gmra.mrb[0].mxu0 %vm410_vm1, %v406_v33  ;;  %v388_v38 = vmax.f32 %v380_v35, 0.0 }
  0x3d   : > { %v395_v39 = vadd.f32 %v387_v37, %v354_v34 }
  0x3e   : > { %v396_v40 = vadd.f32 %v388_v38, %v355_v36 }
  0x3f   : > { %v403_v41 = vmul.f32 0.25, %v395_v39 }
  0x40   : > { %v404_v42 = vmul.f32 0.25, %v396_v40 }
  0x42   : > { %v408_v2 = vpack.c.bf16 %v404_v42, %v403_v41 }
  0x44   : > { %652 = vmatmul.mubr.msk.bf16.vlgmr.msra.gmra.mrb[0].mxu1 %vm410_vm1, %v408_v2 }
 0x10f   : > { %v649_v43 = vpop.f32.mrb[0].mxu0 }
 0x110   : > { %494 = vst [vmem:[%s215_s22 + $0x10] sm:$0xff] %v649_v43  ;;  %v461_v44 = vpop.f32.mrb[1].mxu0 }
 0x111   : > { %492 = vst [vmem:[%s215_s22] sm:$0xff] %v461_v44  ;;  %v650_v3 = vpop.f32.mrb[2].mxu0 }
 0x112   : > { %495 = vst [vmem:[%s215_s22 + $0x18] sm:$0xff] %v650_v3  ;;  %v464_v45 = vpop.f32.mrb[3].mxu0 }
 0x113   : > { %493 = vst [vmem:[%s215_s22 + $0x8] sm:$0xff] %v464_v45 }
 0x117   : > { %v653_v46 = vpop.f32.mrb[0].mxu1 }
 0x118   : > { %498 = vst [vmem:[%s215_s22 + $0x30] sm:$0xff] %v653_v46  ;;  %v477_v47 = vpop.f32.mrb[1].mxu1 }
 0x119   : > { %496 = vst [vmem:[%s215_s22 + $0x20] sm:$0xff] %v477_v47  ;;  %v654_v48 = vpop.f32.mrb[2].mxu1 }
 0x11a   : > { %499 = vst [vmem:[%s215_s22 + $0x38] sm:$0xff] %v654_v48  ;;  %v480_v49 = vpop.f32.mrb[3].mxu1 }
 0x11b   : > { %497 = vst [vmem:[%s215_s22 + $0x28] sm:$0xff] %v480_v49 }
 0x11c   : > { %729 = shalt.err (!%p726_p5)
}
 0x11d   : > { %s730_s10 = scalar_lea.hbm %s1006_s5, 1024  ;;  %s734_s13 = scalar_lea.hbm %s1058_s4, 2048 }
 0x11e   : > { %p731_p6 = scmp.ne.s32.totalorder %s1006_s5, %s730_s10  ;;  %p735_p10 = scmp.lt.u32.totalorder %s1006_s5, %s1058_s4 }
 0x11f   : > { %p736_p11 = scmp.lt.u32.totalorder %s734_s13, %s730_s10  ;;  %p738_p13 = scmp.lt.u32.totalorder %s730_s10, %s1006_s5 }
 0x120   : > { %p732_p7 = pnand %p731_p6, %p864_p4 }
 0x121   : > { %p737_p12 = por %p736_p11, %p735_p10 }
 0x122   : > { %p733_p9 = pneg %p732_p7 }
 0x123   : > { %p739_p0 = por %p738_p13, %p737_p12 }
 0x125   : > { %p740_p1 = pnand %p739_p0, %p733_p9 }
 0x127   : > { %743 = shalt.err (!%p740_p1)
}
 0x128   : > { %s797_s22 = smov 128   ;;  %s798_s26 = smov 8  }
 0x129   : > { %659 = dma.vmem_to_hbm [thread:$0]  (%p864_p4), %s1001_s24, 1024, %s1006_s5, %s1008_s6, %s797_s22, %s797_s22, %s798_s26  }
 0x12a PF: > { %p665_p2 = scmp.ge.s32.totalorder %s794_s20, 2  ;;  %s531_s29 = sand.u32 1, %s774_s15  }
 0x12b   : > { %s532_s30 = scalar_lea.sflag [#allocation3], %s531_s29 }
 0x12c   : > { %p662_p3 = pnand %p665_p2, %p871_p8 }
 0x12e   : > { %769 = dma.done.wait (!%p662_p3), %s532_s30, 1024  }
 0x12f   : > { %771 = vsyncadd (!%p662_p3), %s532_s30, 4294966272  ;;  %s17_s20 = sadd.s32 1, %s794_s20   ;;  %s1061_s15 = smov %s778_s16 }
 0x130   : > { %p14_p5 = scmp.ge.s32.totalorder %s17_s20, 4   ;;  %s1062_s16 = smov %s782_s17 }
 0x131   : > { %s1063_s17 = smov %s877_s28  ;;  %s1064_s18 = smov %s790_s19 }
 0x132   : > { %s1065_s19 = smov %s1067_s23  ;;  %16 = sbr.rel (!%p14_p5) target bundleno = 4 (0x4), region = 74 }
 0x139   :  { %537 = vsyncpa [#allocation3], 1 }
 0x13a   :  { %539 = vsyncpa [#allocation3 + $0x1], 1 }

</bundles_post_ra>
